<compile_context>
chip_gen: v7x
topology: tpu7x:2x2x1
jax: 0.10.0
libtpu: 0.0.40
codegen_flags: <defaults>
</compile_context>

<pallas_src>
import functools

import jax
import jax.numpy as jnp
from jax.experimental import pallas as pl
from jax.experimental.pallas import tpu as pltpu

_LANE = 128
_SUBLANE = 8
_TILE_VMEM_BUDGET = 12 * 1024 * 1024   # double-buffered input bytes per step


def _focal_loss_kernel(gamma, alpha, num_classes, tile_rows,
                       logits_ref, target_ref, out_ref):
    """Grid step (n, s, j): (C, tile_rows, 128) logits + (tile_rows, 128) targets."""
    @pl.when(pl.program_id(2) == 0)
    def _init():
        out_ref[...] = jnp.zeros_like(out_ref)

    t = target_ref[...].astype(jnp.int32)   # widen in-register (HBM stays narrow)

    if num_classes == 2:
        # Binary (SNUNet) specialization: log-softmax via one stable softplus on
        # d = x0 - x1 -> 2 EUP transcendentals instead of 3 for the pair.
        x0 = logits_ref[0].astype(jnp.float32)
        x1 = logits_ref[1].astype(jnp.float32)
        d = x0 - x1
        e = jnp.exp(-jnp.abs(d))
        lse = jnp.log(1.0 + e)                      # softplus(-|d|)
        logp0 = jnp.minimum(d, 0.0) - lse           # = -softplus(-d)
        logp1 = jnp.minimum(-d, 0.0) - lse          # = -softplus(d)
        sel0 = t == 0
        sel1 = t == 1
        logpt = jnp.where(sel0, logp0, jnp.where(sel1, logp1, 0.0))
        if alpha is not None:
            at = jnp.where(sel0, jnp.float32(alpha[0]),
                           jnp.where(sel1, jnp.float32(alpha[1]), 0.0))
    else:
        # Generic class count: streaming max / sum-exp (all element-wise VPU
        # work, no XLU reductions).  The select loop re-reads logits from VMEM
        # (vld slots have slack) instead of keeping C slabs live in vregs.
        m = logits_ref[0].astype(jnp.float32)
        for c in range(1, num_classes):
            m = jnp.maximum(m, logits_ref[c].astype(jnp.float32))
        denom = jnp.exp(logits_ref[0].astype(jnp.float32) - m)
        for c in range(1, num_classes):
            denom = denom + jnp.exp(logits_ref[c].astype(jnp.float32) - m)
        shift = m + jnp.log(denom)                  # per-pixel log-sum-exp
        logpt = jnp.zeros_like(m)
        at = jnp.zeros_like(m) if alpha is not None else None
        for c in range(num_classes):                # fused logpt/alpha select
            sel = t == c
            logpt = jnp.where(
                sel, logits_ref[c].astype(jnp.float32) - shift, logpt)
            if alpha is not None:
                at = jnp.where(sel, jnp.float32(alpha[c]), at)

    # Sentinel/padded pixels match no class -> logpt == 0 -> pt == 1 -> loss 0.
    pt = jnp.exp(logpt)
    weighted = at * logpt if alpha is not None else logpt

    g = float(gamma)
    if g == 0.0:
        loss = -weighted
    elif g.is_integer() and 0.0 < g <= 8.0:
        # Small integer gamma -> multiplies (VPU) instead of a pow (EUP).
        one_minus = 1.0 - pt
        focal = one_minus
        for _ in range(int(g) - 1):
            focal = focal * one_minus
        loss = -focal * weighted
    else:
        # NOTE: clamps (1 - pt) at 0 before the non-integer pow; the reference
        # would NaN if rounding ever pushed pt above 1.
        loss = -(jnp.maximum(1.0 - pt, 0.0) ** g) * weighted

    # Fold the (tile_rows, 128) tile into an (8, 128) lane-dense partial sum
    # with plain vreg adds, so the resident accumulator / writeback stay tiny.
    if tile_rows % _SUBLANE == 0 and tile_rows > _SUBLANE:
        loss = loss.reshape(tile_rows // _SUBLANE, _SUBLANE, _LANE).sum(axis=0)
    out_ref[...] += loss


def _plan_tiles(rows, num_classes, logit_bytes, tgt_bytes, max_tile_rows):
    """Pick (tile_rows, bulk_rows).  bulk_rows rows go to the kernel grid."""
    bytes_per_row = _LANE * (num_classes * logit_bytes + tgt_bytes)
    vmem_cap = (_TILE_VMEM_BUDGET // (2 * bytes_per_row))
    vmem_cap = max(_SUBLANE, vmem_cap - vmem_cap % _SUBLANE)
    limit = max(_SUBLANE, min(max_tile_rows, vmem_cap))
    limit -= limit % _SUBLANE

    if rows <= limit:
        return rows, rows                  # single full-extent tile, exact cover

    # Prefer an exact divisor as long as steps stay large enough to amortize the
    # ~0.35 us per-step overhead (>= 64 rows == 8192 pixels per step).
    min_rows = min(64, limit)
    for cand in range(limit, min_rows - 1, -_SUBLANE):
        if rows % cand == 0:
            return cand, rows

    # No good divisor: kernel covers the largest multiple of the tile; the small
    # leftover (< one tile) is handled by the XLA epilogue in the wrapper.
    return limit, (rows // limit) * limit


def _focal_loss_sum_jax(x, t, gamma, alpha_t, num_classes):
    """Plain-XLA focal-loss sum for the (tiny) leftover rows the grid skips."""
    logp = jax.nn.log_softmax(x.astype(jnp.float32), axis=1)
    tt = t.astype(jnp.int32)
    valid = jnp.logical_and(tt >= 0, tt < num_classes)
    tc = jnp.where(valid, tt, 0)
    logpt = jnp.take_along_axis(logp, tc[:, None, :, :], axis=1)[:, 0]
    pt = jnp.exp(logpt)
    if alpha_t is not None:
        avec = jnp.asarray(alpha_t, jnp.float32)
        logpt = logpt * avec[tc]
    loss = -((1.0 - pt) ** float(gamma)) * logpt
    return jnp.sum(jnp.where(valid, loss, 0.0))


def focal_loss(logits_nchw, target_nhw, *, gamma=0.0, alpha=None,
               size_average=True, max_tile_rows=512):
    """Pallas implementation of FocalLoss.forward (PyTorch semantics)."""
    N, C, H, W = logits_nchw.shape
    HW = H * W
    M = N * HW

    # alpha handling as in FocalLoss.__init__ (baked as compile-time constants).
    if alpha is None:
        alpha_t = None
    elif isinstance(alpha, (float, int)):
        alpha_t = (float(alpha), 1.0 - float(alpha))
    else:
        alpha_t = tuple(float(a) for a in jnp.asarray(alpha).reshape(-1))
    if alpha_t is not None and len(alpha_t) != C:
        raise ValueError("alpha must provide one weight per class")

    # Free reshapes only: NCHW already has the pixel axis lane-dense.
    x = logits_nchw.reshape(N, C, HW)
    t = target_nhw.reshape(N, HW)
    if not jnp.issubdtype(t.dtype, jnp.integer):
        t = t.astype(jnp.int32)
    # Targets keep their native integer width; int8/int16 targets produced
    # upstream directly cut HBM traffic on the memory-bound v5e/v6e.

    hw_pad = -(-HW // _LANE) * _LANE
    if hw_pad != HW:
        # TODO(synk): ragged H*W (not a multiple of 128) still costs one extra
        # HBM pass here; padded pixels carry the sentinel class C and therefore
        # contribute exactly zero loss inside the kernel.
        if jnp.iinfo(t.dtype).max < C:
            t = t.astype(jnp.int32)
        x = jnp.pad(x, ((0, 0), (0, 0), (0, hw_pad - HW)))
        t = jnp.pad(t, ((0, 0), (0, hw_pad - HW)), constant_values=C)

    rows = hw_pad // _LANE
    x = x.reshape(N, C, rows, _LANE)
    t = t.reshape(N, rows, _LANE)

    tile_rows, bulk_rows = _plan_tiles(
        rows, C, jnp.dtype(x.dtype).itemsize, jnp.dtype(t.dtype).itemsize,
        max_tile_rows)

    total_tiles = bulk_rows // tile_rows
    # Split the pixel-tile axis into (super, inner) so v7x megacore can share
    # the work even when N == 1; accumulators are private per (n, super).
    S = 2 if (total_tiles >= 2 and total_tiles % 2 == 0) else 1
    J = total_tiles // S
    out_rows = _SUBLANE if tile_rows % _SUBLANE == 0 else tile_rows

    kernel = functools.partial(_focal_loss_kernel, float(gamma), alpha_t, C,
                               tile_rows)

    partial_sums = pl.pallas_call(
        kernel,
        out_shape=jax.ShapeDtypeStruct((N, S, out_rows, _LANE), jnp.float32),
        grid_spec=pltpu.PrefetchScalarGridSpec(
            num_scalar_prefetch=0,
            grid=(N, S, J),
            in_specs=[
                pl.BlockSpec((pl.Squeezed(), C, tile_rows, _LANE),
                             lambda n, s, j: (n, 0, s * J + j, 0)),
                pl.BlockSpec((pl.Squeezed(), tile_rows, _LANE),
                             lambda n, s, j: (n, s * J + j, 0)),
            ],
            out_specs=pl.BlockSpec(
                (pl.Squeezed(), pl.Squeezed(), out_rows, _LANE),
                lambda n, s, j: (n, s, 0, 0)),
        ),
        compiler_params=pltpu.CompilerParams(
            dimension_semantics=("parallel", "parallel", "arbitrary"),
            # Raise v5e's 16 MiB scoped-VMEM default; the tile plan above keeps
            # the double-buffered footprint <= ~12 MiB so this also fits v7x's
            # 64 MiB physical VMEM with room to spare.
            vmem_limit_bytes=32 * 1024 * 1024),
    )(x, t)

    loss_sum = jnp.sum(partial_sums)

    if bulk_rows != rows:
        # Leftover rows (< one tile per image) that the tiled grid does not
        # cover: a tiny fused XLA epilogue instead of shrinking the tile.
        loss_sum = loss_sum + _focal_loss_sum_jax(
            x[:, :, bulk_rows:, :], t[:, bulk_rows:, :], gamma, alpha_t, C)

    if size_average:
        return loss_sum / jnp.float32(M)
    return loss_sum


def focal_loss_ref(logits_nchw, target_nhw, *, gamma=0.0, alpha=None,
                   size_average=True):
    """Pure-JAX reference matching the PyTorch module."""
    N, C, H, W = logits_nchw.shape
    xf = logits_nchw.reshape(N, C, H * W).transpose(0, 2, 1).reshape(-1, C)
    tf = target_nhw.reshape(-1).astype(jnp.int32)
    logp = jax.nn.log_softmax(xf.astype(jnp.float32), axis=1)
    logpt = jnp.take_along_axis(logp, tf[:, None], axis=1)[:, 0]
    pt = jnp.exp(logpt)
    if alpha is not None:
        if isinstance(alpha, (float, int)):
            avec = jnp.array([alpha, 1.0 - alpha], jnp.float32)
        else:
            avec = jnp.asarray(alpha, jnp.float32)
        logpt = logpt * avec[tf]
    loss = -((1.0 - pt) ** float(gamma)) * logpt
    return loss.mean() if size_average else loss.sum()


if __name__ == "__main__":
    key = jax.random.PRNGKey(0)
    keys = jax.random.split(key, 8)

    # SNUNet change detection: 2 classes, NCHW logits, HxW integer target map.
    N, C, H, W = 2, 2, 16, 16
    logits = jax.random.normal(keys[0], (N, C, H, W), dtype=jnp.float32)
    target = jax.random.randint(keys[1], (N, H, W), 0, C, dtype=jnp.int32)

    # 1) focal loss: gamma=2, per-class alpha, mean reduction.
    out1 = jax.block_until_ready(
        focal_loss(logits, target, gamma=2.0, alpha=[0.25, 0.75],
                   size_average=True))
    ref1 = focal_loss_ref(logits, target, gamma=2.0, alpha=[0.25, 0.75],
                          size_average=True)
    assert jnp.allclose(out1, ref1, rtol=1e-5, atol=1e-5), (out1, ref1)

    # 2) plain NLL (gamma=0, no alpha), sum reduction.
    out2 = jax.block_until_ready(
        focal_loss(logits, target, gamma=0.0, alpha=None, size_average=False))
    ref2 = focal_loss_ref(logits, target, gamma=0.0, alpha=None,
                          size_average=False)
    assert jnp.allclose(out2, ref2, rtol=1e-5, atol=1e-4), (out2, ref2)

    # 3) generic C>2 path + ragged H*W (not a multiple of 128) + non-integer gamma.
    N3, C3, H3, W3 = 1, 3, 20, 20
    logits3 = jax.random.normal(keys[2], (N3, C3, H3, W3), dtype=jnp.float32)
    target3 = jax.random.randint(keys[3], (N3, H3, W3), 0, C3, dtype=jnp.int32)
    out3 = jax.block_until_ready(
        focal_loss(logits3, target3, gamma=1.5, alpha=[0.2, 0.3, 0.5],
                   size_average=True))
    ref3 = focal_loss_ref(logits3, target3, gamma=1.5, alpha=[0.2, 0.3, 0.5],
                          size_average=True)
    assert jnp.allclose(out3, ref3, rtol=1e-5, atol=1e-5), (out3, ref3)

    # 4) multi-tile accumulation + (super, inner) grid split + accumulator fold
    #    + scalar alpha + bf16 logits (small max_tile_rows to force many tiles).
    N4, C4, H4, W4 = 2, 2, 128, 64
    logits4 = jax.random.normal(keys[4], (N4, C4, H4, W4), dtype=jnp.bfloat16)
    target4 = jax.random.randint(keys[5], (N4, H4, W4), 0, C4, dtype=jnp.int32)
    out4 = jax.block_until_ready(
        focal_loss(logits4, target4, gamma=2.0, alpha=0.25, size_average=True,
                   max_tile_rows=16))
    ref4 = focal_loss_ref(logits4, target4, gamma=2.0, alpha=0.25,
                          size_average=True)
    assert jnp.allclose(out4, ref4, rtol=1e-4, atol=1e-4), (out4, ref4)

    # 5) row count not divisible by the tile -> bulk kernel + XLA epilogue path.
    N5, C5, H5, W5 = 1, 2, 10, 128
    logits5 = jax.random.normal(keys[6], (N5, C5, H5, W5), dtype=jnp.float32)
    target5 = jax.random.randint(keys[7], (N5, H5, W5), 0, C5, dtype=jnp.int32)
    out5 = jax.block_until_ready(
        focal_loss(logits5, target5, gamma=2.0, alpha=None, size_average=False,
                   max_tile_rows=8))
    ref5 = focal_loss_ref(logits5, target5, gamma=2.0, alpha=None,
                          size_average=False)
    assert jnp.allclose(out5, ref5, rtol=1e-5, atol=1e-4), (out5, ref5)

    print("KERNEL_OK")
</pallas_src>

<mosaic_0001>
module attributes {stable_mosaic.version = 11 : i64} {
  func.func @_focal_loss_kernel(%arg0: i32, %arg1: i32, %arg2: i32, %arg3: memref<1x2x2x128xf32, #tpu.memory_space<vmem>>, %arg4: memref<1x2x128xi32, #tpu.memory_space<vmem>>, %arg5: memref<1x1x2x128xf32, #tpu.memory_space<vmem>>) attributes {dimension_semantics = [#tpu.dimension_semantics<parallel>, #tpu.dimension_semantics<parallel>, #tpu.dimension_semantics<arbitrary>], iteration_bounds = array<i64: 2, 1, 1>, scalar_prefetch = 0 : i64, scratch_operands = 0 : i64, tpu.core_type = #tpu.core_type<tc>, window_params = [{transform_indices = @transform_0, window_bounds = array<i64: 1, 2, 2, 128>}, {transform_indices = @transform_1, window_bounds = array<i64: 1, 2, 128>}, {transform_indices = @transform_2, window_bounds = array<i64: 1, 1, 2, 128>}]} {
    %c0_i32 = arith.constant 0 : i32
    %0 = arith.cmpi eq, %arg2, %c0_i32 : i32
    %1 = arith.extui %0 : i1 to i32
    %c0_i32_0 = arith.constant 0 : i32
    %2 = arith.cmpi ne, %1, %c0_i32_0 : i32
    scf.if %2 {
      %cst_29 = arith.constant 0.000000e+00 : f32
      %51 = vector.broadcast %cst_29 : f32 to vector<2x128xf32>
      %c0_30 = arith.constant 0 : index
      %c0_31 = arith.constant 0 : index
      %c0_32 = arith.constant 0 : index
      %c0_33 = arith.constant 0 : index
      %52 = vector.load %arg5[%c0_30, %c0_31, %c0_32, %c0_33] : memref<1x1x2x128xf32, #tpu.memory_space<vmem>>, vector<1x1x2x128xf32>
      %53 = vector.shape_cast %52 : vector<1x1x2x128xf32> to vector<2x128xf32>
      %54 = vector.shape_cast %51 : vector<2x128xf32> to vector<1x1x2x128xf32>
      tpu.vector_store %arg5[%c0_30, %c0_31, %c0_32, %c0_33], %54 {strides = array<i32>} : memref<1x1x2x128xf32, #tpu.memory_space<vmem>>, vector<1x1x2x128xf32>,
    } else {
    }
    %c0 = arith.constant 0 : index
    %c0_1 = arith.constant 0 : index
    %c0_2 = arith.constant 0 : index
    %3 = vector.load %arg4[%c0, %c0_1, %c0_2] : memref<1x2x128xi32, #tpu.memory_space<vmem>>, vector<1x2x128xi32>
    %4 = vector.shape_cast %3 : vector<1x2x128xi32> to vector<2x128xi32>
    %c0_3 = arith.constant 0 : index
    %c0_4 = arith.constant 0 : index
    %c0_5 = arith.constant 0 : index
    %c0_6 = arith.constant 0 : index
    %5 = vector.load %arg3[%c0_3, %c0_4, %c0_5, %c0_6] : memref<1x2x2x128xf32, #tpu.memory_space<vmem>>, vector<1x1x2x128xf32>
    %6 = vector.shape_cast %5 : vector<1x1x2x128xf32> to vector<2x128xf32>
    %c0_7 = arith.constant 0 : index
    %c1 = arith.constant 1 : index
    %c0_8 = arith.constant 0 : index
    %c0_9 = arith.constant 0 : index
    %7 = vector.load %arg3[%c0_7, %c1, %c0_8, %c0_9] : memref<1x2x2x128xf32, #tpu.memory_space<vmem>>, vector<1x1x2x128xf32>
    %8 = vector.shape_cast %7 : vector<1x1x2x128xf32> to vector<2x128xf32>
    %9 = arith.subf %6, %8 : vector<2x128xf32>
    %10 = math.absf %9 : vector<2x128xf32>
    %cst = arith.constant 0.000000e+00 : f32
    %11 = vector.broadcast %cst : f32 to vector<2x128xf32>
    %12 = arith.subf %11, %10 : vector<2x128xf32>
    %13 = math.exp %12 : vector<2x128xf32>
    %cst_10 = arith.constant 1.000000e+00 : f32
    %14 = vector.broadcast %cst_10 : f32 to vector<2x128xf32>
    %15 = arith.addf %14, %13 : vector<2x128xf32>
    %16 = math.log %15 : vector<2x128xf32>
    %cst_11 = arith.constant 0.000000e+00 : f32
    %17 = vector.broadcast %cst_11 : f32 to vector<2x128xf32>
    %18 = arith.minimumf %9, %17 : vector<2x128xf32>
    %19 = arith.subf %18, %16 : vector<2x128xf32>
    %cst_12 = arith.constant 0.000000e+00 : f32
    %20 = vector.broadcast %cst_12 : f32 to vector<2x128xf32>
    %21 = arith.subf %20, %9 : vector<2x128xf32>
    %cst_13 = arith.constant 0.000000e+00 : f32
    %22 = vector.broadcast %cst_13 : f32 to vector<2x128xf32>
    %23 = arith.minimumf %21, %22 : vector<2x128xf32>
    %24 = arith.subf %23, %16 : vector<2x128xf32>
    %c0_i32_14 = arith.constant 0 : i32
    %25 = vector.broadcast %c0_i32_14 : i32 to vector<2x128xi32>
    %26 = arith.cmpi eq, %4, %25 : vector<2x128xi32>
    %c1_i32 = arith.constant 1 : i32
    %27 = vector.broadcast %c1_i32 : i32 to vector<2x128xi32>
    %28 = arith.cmpi eq, %4, %27 : vector<2x128xi32>
    %cst_15 = arith.constant 0.000000e+00 : f32
    %29 = vector.broadcast %cst_15 : f32 to vector<2x128xf32>
    %30 = arith.select %28, %24, %29 : vector<2x128xi1>, vector<2x128xf32>
    %31 = arith.select %26, %19, %30 : vector<2x128xi1>, vector<2x128xf32>
    %cst_16 = arith.constant 7.500000e-01 : f32
    %cst_17 = arith.constant 0.000000e+00 : f32
    %32 = vector.broadcast %cst_16 : f32 to vector<2x128xf32>
    %33 = vector.broadcast %cst_17 : f32 to vector<2x128xf32>
    %34 = arith.select %28, %32, %33 : vector<2x128xi1>, vector<2x128xf32>
    %cst_18 = arith.constant 2.500000e-01 : f32
    %35 = vector.broadcast %cst_18 : f32 to vector<2x128xf32>
    %36 = arith.select %26, %35, %34 : vector<2x128xi1>, vector<2x128xf32>
    %37 = math.exp %31 : vector<2x128xf32>
    %38 = arith.mulf %36, %31 : vector<2x128xf32>
    %cst_19 = arith.constant 1.000000e+00 : f32
    %39 = vector.broadcast %cst_19 : f32 to vector<2x128xf32>
    %40 = arith.subf %39, %37 : vector<2x128xf32>
    %41 = arith.mulf %40, %40 : vector<2x128xf32>
    %cst_20 = arith.constant 0.000000e+00 : f32
    %42 = vector.broadcast %cst_20 : f32 to vector<2x128xf32>
    %43 = arith.subf %42, %41 : vector<2x128xf32>
    %44 = arith.mulf %43, %38 : vector<2x128xf32>
    %c0_21 = arith.constant 0 : index
    %c0_22 = arith.constant 0 : index
    %c0_23 = arith.constant 0 : index
    %c0_24 = arith.constant 0 : index
    %45 = vector.load %arg5[%c0_21, %c0_22, %c0_23, %c0_24] : memref<1x1x2x128xf32, #tpu.memory_space<vmem>>, vector<1x1x2x128xf32>
    %46 = vector.shape_cast %45 : vector<1x1x2x128xf32> to vector<2x128xf32>
    %47 = arith.addf %46, %44 : vector<2x128xf32>
    %c0_25 = arith.constant 0 : index
    %c0_26 = arith.constant 0 : index
    %c0_27 = arith.constant 0 : index
    %c0_28 = arith.constant 0 : index
    %48 = vector.load %arg5[%c0_25, %c0_26, %c0_27, %c0_28] : memref<1x1x2x128xf32, #tpu.memory_space<vmem>>, vector<1x1x2x128xf32>
    %49 = vector.shape_cast %48 : vector<1x1x2x128xf32> to vector<2x128xf32>
    %50 = vector.shape_cast %47 : vector<2x128xf32> to vector<1x1x2x128xf32>
    tpu.vector_store %arg5[%c0_25, %c0_26, %c0_27, %c0_28], %50 {strides = array<i32>} : memref<1x1x2x128xf32, #tpu.memory_space<vmem>>, vector<1x1x2x128xf32>,
    return
  }
  func.func @transform_0(%arg0: i32, %arg1: i32, %arg2: i32) -> (i32, i32, i32, i32) {
    %c1_i32 = arith.constant 1 : i32
    %0 = arith.muli %arg1, %c1_i32 : i32
    %1 = arith.addi %0, %arg2 : i32
    %c0_i32 = arith.constant 0 : i32
    %c0_i32_0 = arith.constant 0 : i32
    %c0_i32_1 = arith.constant 0 : i32
    return %arg0, %c0_i32, %1, %c0_i32_0 : i32, i32, i32, i32
  }
  func.func @transform_1(%arg0: i32, %arg1: i32, %arg2: i32) -> (i32, i32, i32) {
    %c1_i32 = arith.constant 1 : i32
    %0 = arith.muli %arg1, %c1_i32 : i32
    %1 = arith.addi %0, %arg2 : i32
    %c0_i32 = arith.constant 0 : i32
    %c0_i32_0 = arith.constant 0 : i32
    return %arg0, %1, %c0_i32 : i32, i32, i32
  }
  func.func @transform_2(%arg0: i32, %arg1: i32, %arg2: i32) -> (i32, i32, i32, i32) {
    %c0_i32 = arith.constant 0 : i32
    %c0_i32_0 = arith.constant 0 : i32
    %c0_i32_1 = arith.constant 0 : i32
    return %arg0, %arg1, %c0_i32, %c0_i32_0 : i32, i32, i32, i32
  }
}

</mosaic_0001>

<bundles_post_ra>
// kernel: tpu_custom_call.1
= control target key start
LH: loop header
LB: loop body
LE: loop exit
PB: predicated region body
PF: predicated region fallthrough
CT: control target
= control target key end

     0   :  { %7 = vsyncpa [#allocation3], 0  ;;  %s882_s0 = inlined_call_operand.hbm [shape: f32[2,2,2,128], index: 0, kind: input, shape index: {}]   ;;  %s883_s1 = inlined_call_operand.hbm [shape: s32[2,2,128], index: 1, kind: input, shape index: {}]   ;;  %s884_s2 = inlined_call_operand.hbm [shape: f32[2,1,2,128], index: 2, kind: output, shape index: {}]  }
   0x1   :  { %9 = vsyncpa [#allocation3 + $0x1], 0 }
   0x2   :  { %10 = vsyncpa [#allocation6], 0 }
   0x3   :  { %12 = vsyncpa [#allocation6 + $0x1], 0 }
   0x4   :  { %13 = vsyncpa [#allocation4], 0 }
   0x5   :  { %15 = vsyncpa [#allocation4 + $0x1], 0  ;;  %s661_s9 = smov 0   ;;  %s663_s10 = smov 0  }
   0x6   :  { %s665_s11 = smov 0   ;;  %s667_s12 = smov 0  }
   0x7   :  { %s669_s13 = smov 0   ;;  %s671_s14 = smov 0  }
   0x8 LB: > { %s397_s15 = sadd.s32 4294967295, %s638_s14   ;;  %s398_s16 = sadd.s32 4294967294, %s638_s14   ;;  %s638_s14 = sphi %s671_s14, %s21_s14   ;;  %s634_s13 = sphi %s669_s13, %s903_s13   ;;  %s630_s12 = sphi %s667_s12, %s902_s12   ;;  %s626_s11 = sphi %s665_s11, %s901_s11   ;;  %s622_s10 = sphi %s663_s10, %s900_s10   ;;  %s618_s9 = sphi %s661_s9, %s899_s9  }
   0x9   : > { %s40_s17 = sadd.s32 1, %s634_s13  ;;  %s51_s18 = sadd.s32 1, %s626_s11 }
   0xa   : > { %p42_p0 = scmp.ge.s32.totalorder %s40_s17, 2  ;;  %p58_p1 = scmp.ne.s32.totalorder %s626_s11, %s622_s10 }
   0xb   : > { %p59_p2 = scmp.eq.s32.totalorder %s638_s14, 0  ;;  %p64_p3 = scmp.ne.s32.totalorder %s622_s10, %s618_s9 }
   0xc   : > { %s905_s17 = smov (%p42_p0, %s40_s17), 0  ;;  %p65_p5 = scmp.eq.s32.totalorder %s397_s15, 0 }
   0xd   : > { %p702_p4 = por %p59_p2, %p58_p1  ;;  %s46_s20 = ssub.s32 %s634_s13, %s905_s17 }
   0xe   : > { %p120_p6 = scmp.eq.s32.totalorder %s397_s15, 1  ;;  %p49_p7 = scmp.eq.s32.totalorder %s46_s20, 0 }
   0xf   : > { %p708_p8 = por %p65_p5, %p64_p3  ;;  %p126_p10 = scmp.eq.s32.totalorder %s398_s16, 1 }
  0x10   : > { %p712_p9 = por %p120_p6, %p58_p1  ;;  %p433_p13 = scmp.lt.s32.totalorder %s638_s14, 2 }
  0x11   : > { %s888_s21 = scalar_select %p708_p8, 1, 0 }
  0x12   : > { %s889_s22 = scalar_select %p712_p9, 1, 0 }
  0x13   : > { %s717_s23 = scalar_select %p49_p7, %s626_s11, %s51_s18  }
  0x14   : > { %p719_p11 = por %p126_p10, %p64_p3  ;;  %s726_s25 = sand.u32 1, %s626_s11  }
  0x15   : > { %s401_s26 = sshll.u32 %s726_s25, 2  ;;  %s415_s27 = sshll.u32 %s634_s13, 6 }
  0x16   : > { %s890_s24 = scalar_select %p719_p11, 1, 0 }
  0x17   : > { %s733_s30 = scalar_lea.hbm %s882_s0, %s415_s27  ;;  %s150_s3 = scalar_lea.vmem [#allocation2], %s401_s26 }
  0x18   : > { %s159_s4 = sshll.u32 %s150_s3, 4  ;;  %p739_p0 = pnand %p433_p13, %p702_p4  ;;  %s735_s4 = int_to_ptr.vmem [resolvable:$true] %s159_s4 }
  0x19   : > { %s147_s6 = scalar_lea.sflag [#allocation3], %s726_s25  ;;  %s492_s7 = scalar_lea.hbm %s733_s30, 64 }
  0x1a   : > { %p493_p2 = scmp.ne.s32.totalorder %s733_s30, %s492_s7  ;;  %p494_p3 = pneg %p739_p0 }
  0x1b   : > { %s497_s16 = scalar_lea.hbm %s882_s0, 128  ;;  %p498_p4 = scmp.lt.u32.totalorder %s733_s30, %s882_s0 }
  0x1c   : > { %p495_p5 = pnand %p494_p3, %p493_p2  ;;  %p499_p7 = scmp.lt.u32.totalorder %s497_s16, %s492_s7 }
  0x1d   : > { %p501_p13 = scmp.lt.u32.totalorder %s492_s7, %s733_s30 }
  0x1e   : > { %p496_p6 = pneg %p495_p5  ;;  %p500_p10 = por %p499_p7, %p498_p4 }
  0x20   : > { %p502_p12 = por %p501_p13, %p500_p10 }
  0x22   : > { %p503_p1 = pnand %p502_p12, %p496_p6 }
  0x24   : > { %506 = shalt.err (!%p503_p1)
}
  0x25   : > { %s507_s20 = scalar_lea.vmem %s735_s4, 64  ;;  %s640_s26 = smov [#allocation2]  }
  0x26   : > { %p508_p2 = scmp.ne.s32.totalorder %s735_s4, %s507_s20  ;;  %s512_s27 = sshll.u32 %s640_s26, 4  ;;  %s513_s27 = int_to_ptr.vmem [resolvable:$false] %s512_s27 }
  0x27   : > { %s514_s28 = scalar_lea.vmem %s513_s27, 128  ;;  %p515_p9 = scmp.lt.s32.totalorder %s735_s4, %s513_s27 }
  0x28   : > { %p510_p5 = pnand %p508_p2, %p494_p3  ;;  %p516_p4 = scmp.lt.s32.totalorder %s514_s28, %s507_s20 }
  0x2a   : > { %p511_p11 = pneg %p510_p5  ;;  %p517_p7 = por %p516_p4, %p515_p9 }
  0x2c   : > { %p518_p10 = pnand %p517_p7, %p511_p11 }
  0x2e   : > { %521 = shalt.err (!%p518_p10)
}
  0x2f   : > { %s641_s29 = smov 32   ;;  %s642_s3 = smov 2  }
  0x30   : > { %425 = dma.hbm_to_vmem [thread:$0]  (!%p739_p0), %s733_s30, 64, %s735_s4, %s147_s6, %s641_s29, %s641_s29, %s642_s3  }
  0x31   : > { %p187_p12 = scmp.lt.s32.totalorder %s638_s14, 3  ;;  %s404_s7 = sshll.u32 %s726_s25, 1 }
  0x32   : > { %s405_s8 = sshll.u32 %s634_s13, 5  ;;  %p892_p9 = scmp.ge.s32.totalorder %s638_s14, 1 }
  0x33   : > { %s784_s19 = scalar_lea.hbm %s883_s1, %s405_s8  ;;  %s173_s20 = scalar_lea.vmem [#allocation5], %s404_s7 }
  0x34   : > { %p777_p11 = pnand %p892_p9, %p187_p12  ;;  %s182_s26 = sshll.u32 %s173_s20, 4  ;;  %s183_s26 = int_to_ptr.vmem [resolvable:$true] %s182_s26 }
  0x35   : > { %s170_s30 = scalar_lea.sflag [#allocation6], %s726_s25  ;;  %s522_s4 = scalar_lea.hbm %s784_s19, 32 }
  0x36   : > { %s893_s15 = scalar_select %p777_p11, 1, 0 }
  0x37   : > { %p523_p1 = scmp.ne.s32.totalorder %s784_s19, %s522_s4  ;;  %s527_s28 = scalar_lea.hbm %s883_s1, 64 }
  0x38   : > { %p528_p2 = scmp.lt.u32.totalorder %s784_s19, %s883_s1  ;;  %p529_p5 = scmp.lt.u32.totalorder %s527_s28, %s522_s4 }
  0x39   : > { %p525_p6 = pnand %p523_p1, %p494_p3  ;;  %p531_p7 = scmp.lt.u32.totalorder %s522_s4, %s784_s19 }
  0x3a   : > { %p530_p4 = por %p529_p5, %p528_p2 }
  0x3b   : > { %p526_p13 = pneg %p525_p6 }
  0x3c   : > { %p532_p10 = por %p531_p7, %p530_p4 }
  0x3e   : > { %p533_p12 = pnand %p532_p10, %p526_p13 }
  0x40   : > { %536 = shalt.err (!%p533_p12)
}
  0x41   : > { %s537_s25 = scalar_lea.vmem %s183_s26, 32  ;;  %s643_s7 = smov [#allocation5]  }
  0x42   : > { %p538_p9 = scmp.ne.s32.totalorder %s183_s26, %s537_s25  ;;  %s542_s8 = sshll.u32 %s643_s7, 4  ;;  %s543_s8 = int_to_ptr.vmem [resolvable:$false] %s542_s8 }
  0x43   : > { %s544_s16 = scalar_lea.vmem %s543_s8, 64  ;;  %p545_p8 = scmp.lt.s32.totalorder %s183_s26, %s543_s8 }
  0x44   : > { %p540_p1 = pnand %p538_p9, %p494_p3  ;;  %p546_p11 = scmp.lt.s32.totalorder %s544_s16, %s537_s25 }
  0x46   : > { %p541_p6 = pneg %p540_p1  ;;  %p547_p2 = por %p546_p11, %p545_p8 }
  0x48   : > { %p548_p5 = pnand %p547_p2, %p541_p6 }
  0x4a   : > { %551 = shalt.err (!%p548_p5)
}
  0x4b   : > { %428 = dma.hbm_to_vmem [thread:$0]  (!%p739_p0), %s784_s19, 32, %s183_s26, %s170_s30  }
  0x4c   : > { %p894_p13 = scmp.ne.s32.totalorder %s893_s15, 0 }
  0x4d   : > { %s809_s18 = sand.u32 (!%p894_p13), 1, %s622_s10   ;;  %p895_p3 = scmp.ne.s32.totalorder (!%p894_p13), %s888_s21, 0 }
  0x4e   : > { %191 = sbr.rel (%p894_p13) target bundleno = 166 (0xa6), region = 28  ;;  %s407_s20 = sshll.u32 (!%p894_p13), %s809_s18, 2 }
  0x4f   : > { %s194_s4 = scalar_lea.sflag (!%p894_p13), [#allocation3], %s809_s18  ;;  %s197_s6 = scalar_lea.vmem (!%p894_p13), [#allocation2], %s407_s20 }
  0x55   : > { %605 = dma.done.wait (%p895_p3), %s194_s4, 64  }
  0x56   : > { %607 = vsyncadd (%p895_p3), %s194_s4, 4294967232  ;;  %s408_s5 = sshll.u32 %s809_s18, 1  ;;  %s203_s15 = scalar_lea.sflag [#allocation6], %s809_s18 }
  0x57   : > { %s206_s19 = scalar_lea.vmem [#allocation5], %s408_s5 }
  0x58   : > { %609 = dma.done.wait (%p895_p3), %s203_s15, 32  }
  0x59   : > { %611 = vsyncadd (%p895_p3), %s203_s15, 4294967264  ;;  %s823_s26 = scalar_lea.vmem [#allocation7], %s408_s5  ;;  %v644_v0 = vmov 0.0   ;;  %v240_v1 = vld [vmem:[%s197_s6] sm:$0x3]  ;;  %s412_s21 = sshll.u32 %s630_s12, 5 }
  0x5a   : > { %238 = vst [vmem:[%s823_s26] sm:$0x3] %v644_v0  ;;  %v410_v2 = vld [vmem:[%s197_s6 + $0x2] sm:$0x3]  ;;  %v239_v10 = vld [vmem:[%s206_s19] sm:$0x3]  ;;  %s287_s30 = sshll.u32 %s823_s26, 4  ;;  %s832_s29 = scalar_lea.hbm %s884_s2, %s412_s21  ;;  %s834_s30 = int_to_ptr.vmem [resolvable:$true] %s287_s30 }
  0x5b   : > { %v243_v3 = vsub.f32 %v240_v1, %v410_v2  ;;  %vm257_vm0 = vcmp.eq.s32.totalorder %v239_v10, 1  ;;  %vm256_vm1 = vcmp.eq.s32.totalorder %v239_v10, 0  ;;  %s273_s3 = scalar_lea.sflag [#allocation4], %s809_s18  ;;  %s552_s25 = scalar_lea.vmem %s834_s30, 32 }
  0x5c   : > { %v260_v20 = vsel %vm257_vm0, 0.75, %v644_v0  ;;  %p553_p8 = scmp.ne.s32.totalorder %s834_s30, %s552_s25  ;;  %p896_p0 = scmp.ne.s32.totalorder %s889_s22, 0 }
  0x5d   : > { %v244_v4 = vand.u32 2147483647, %v243_v3  ;;  %v253_v9 = vsub.f32 0.0, %v243_v3  ;;  %v251_v11 = vmin.f32 %v243_v3, 0.0  ;;  %v261_v22 = vsel %vm256_vm1, 0.25, %v260_v20  ;;  %s645_s12 = smov [#allocation7]  }
  0x5e   : > { %p554_p11 = pnand %p553_p8, %p896_p0  ;;  %s556_s7 = sshll.u32 %s645_s12, 4  ;;  %s557_s7 = int_to_ptr.vmem [resolvable:$false] %s556_s7 }
  0x5f   : > { %v245_v5 = vsub.f32 0.0, %v244_v4  ;;  %v254_v12 = vmin.f32 %v253_v9, 0.0  ;;  %s558_s8 = scalar_lea.vmem %s557_s7, 64  ;;  %p559_p7 = scmp.lt.s32.totalorder %s834_s30, %s557_s7 }
  0x60   : > { %p555_p4 = pneg %p554_p11  ;;  %p560_p10 = scmp.lt.s32.totalorder %s558_s8, %s552_s25 }
  0x61   : > { %v246_v6 = vmul.f32 1.442695, %v245_v5  ;;  %v269_v27 = vld [vmem:[%s823_s26] sm:$0x3] }
  0x62   : > { %p561_p12 = por %p560_p10, %p559_p7 }
  0x63   : > { %486 = vpow2.f32 %v246_v6 }
  0x64   : > { %p562_p9 = pnand %p561_p12, %p555_p4 }
  0x6d   : > { %v487_v7 = vpop.eup %486 }
  0x6e   : > { %v248_v8 = vadd.f32 1.0, %v487_v7 }
  0x70   : > { %488 = vlog2.f32 %v248_v8 }
  0x7a   : > { %v489_v13 = vpop.eup %488 }
  0x7b   : > { %v250_v14 = vmul.f32 0.6931472, %v489_v13 }
  0x7d   : > { %v252_v15 = vsub.f32 %v251_v11, %v250_v14  ;;  %v255_v16 = vsub.f32 %v254_v12, %v250_v14 }
  0x7f   : > { %v258_v17 = vsel %vm257_vm0, %v255_v16, 0.0 }
  0x80   : > { %v259_v18 = vsel %vm256_vm1, %v252_v15, %v258_v17 }
  0x81   : > { %v262_v19 = vmul.f32 1.442695, %v259_v18  ;;  %v264_v24 = vmul.f32 %v261_v22, %v259_v18 }
  0x83   : > { %490 = vpow2.f32 %v262_v19 }
  0x8d   : > { %v491_v21 = vpop.eup %490 }
  0x8e   : > { %v265_v23 = vsub.f32 1.0, %v491_v21 }
  0x90   : > { %v266_v25 = vmul.f32 %v265_v23, %v265_v23 }
  0x92   : > { %v267_v26 = vsub.f32 0.0, %v266_v25 }
  0x94   : > { %v268_v28 = vmul.f32 %v267_v26, %v264_v24 }
  0x96   : > { %v270_v29 = vadd.f32 %v269_v27, %v268_v28 }
  0x98   : > { %271 = vst [vmem:[%s823_s26] sm:$0x3] %v270_v29 }
  0x99   : > { %565 = shalt.err (!%p562_p9)
}
  0x9a   : > { %s566_s16 = scalar_lea.hbm %s832_s29, 32  ;;  %s570_s4 = scalar_lea.hbm %s884_s2, 64 }
  0x9b   : > { %p567_p1 = scmp.ne.s32.totalorder %s832_s29, %s566_s16  ;;  %p571_p5 = scmp.lt.u32.totalorder %s832_s29, %s884_s2 }
  0x9c   : > { %p572_p13 = scmp.lt.u32.totalorder %s570_s4, %s566_s16  ;;  %p574_p8 = scmp.lt.u32.totalorder %s566_s16, %s832_s29 }
  0x9d   : > { %p568_p6 = pnand %p567_p1, %p896_p0 }
  0x9e   : > { %p573_p3 = por %p572_p13, %p571_p5 }
  0x9f   : > { %p569_p2 = pneg %p568_p6 }
  0xa0   : > { %p575_p11 = por %p574_p8, %p573_p3 }
  0xa2   : > { %p576_p4 = pnand %p575_p11, %p569_p2 }
  0xa4   : > { %579 = shalt.err (!%p576_p4)
}
  0xa5   : > { %420 = dma.vmem_to_hbm [thread:$0]  (%p896_p0), %s834_s30, 32, %s832_s29, %s273_s3  }
  0xa6 PF: > { %s299_s15 = sand.u32 1, %s618_s9   ;;  %p897_p7 = scmp.ne.s32.totalorder %s890_s24, 0 }
  0xa7   : > { %p898_p10 = scmp.ge.s32.totalorder %s638_s14, 2  ;;  %s300_s19 = scalar_lea.sflag [#allocation4], %s299_s15 }
  0xa9   : > { %p430_p12 = pnand %p898_p10, %p897_p7 }
  0xab   : > { %613 = dma.done.wait (!%p430_p12), %s300_s19, 32  }
  0xac   : > { %615 = vsyncadd (!%p430_p12), %s300_s19, 4294967264  ;;  %s21_s14 = sadd.s32 1, %s638_s14   ;;  %s899_s9 = smov %s622_s10 }
  0xad   : > { %p18_p9 = scmp.ge.s32.totalorder %s21_s14, 4   ;;  %s900_s10 = smov %s626_s11 }
  0xae   : > { %s901_s11 = smov %s717_s23  ;;  %s902_s12 = smov %s634_s13 }
  0xaf   : > { %s903_s13 = smov %s905_s17  ;;  %20 = sbr.rel (!%p18_p9) target bundleno = 8 (0x8), region = 91 }
  0xb6   :  { %305 = vsyncpa [#allocation3], 1 }
  0xb7   :  { %307 = vsyncpa [#allocation3 + $0x1], 1 }
  0xb8   :  { %308 = vsyncpa [#allocation6], 1 }
  0xb9   :  { %310 = vsyncpa [#allocation6 + $0x1], 1 }
  0xba   :  { %311 = vsyncpa [#allocation4], 1 }
  0xbb   :  { %313 = vsyncpa [#allocation4 + $0x1], 1 }

</bundles_post_ra>
